<compile_context>
chip_gen: v7x
topology: tpu7x:2x2x1
jax: 0.10.0
libtpu: 0.0.40
codegen_flags: <defaults>
</compile_context>

<pallas_src>
import jax
import jax.numpy as jnp
import numpy as np
from jax.experimental import pallas as pl
from jax.experimental.pallas import tpu as pltpu

_LANE = 128
_SUBLANE = 8
_NUM_PARTITIONS = 2                      # per-core partial sums (both TCs on v7x)
_TILE_BYTES_TARGET = 2 * 1024 * 1024     # ~2 MiB per f32 input tile


# --------------------------------------------------------------------------- #
# Kernels
# --------------------------------------------------------------------------- #
def _bce_tile(p, t):
    """Elementwise BCE with PyTorch's -100 clamp on each log term (in f32)."""
    p = p.astype(jnp.float32)
    t = t.astype(jnp.float32)
    log_p = jnp.maximum(jnp.log(p), -100.0)
    log_1mp = jnp.maximum(jnp.log(1.0 - p), -100.0)
    return -(t * log_p + (1.0 - t) * log_1mp)


def _accumulate(out_ref, loss):
    """Fold a (tr, lane) loss tile into the resident (1, 8, lane) output block.

    The reshape splits rows exactly on the 8-sublane tile boundary (layout
    free) and the axis-0 sum is plain VPU vreg adds -- no per-step cross-lane
    (XLU) reduce and no scalar RMW carried dependency.
    """
    tr, lane = loss.shape
    partial = loss.reshape(tr // _SUBLANE, _SUBLANE, lane).sum(axis=0)
    out_ref[...] += partial[None, :, :]


def _bce_dense_kernel(pred_ref, tgt_ref, out_ref):
    # Zero this partition's accumulator on its first row step.
    @pl.when(pl.program_id(1) == 0)
    def _():
        out_ref[...] = jnp.zeros_like(out_ref)

    _accumulate(out_ref, _bce_tile(pred_ref[...], tgt_ref[...]))


def _bce_masked_kernel(pred_ref, tgt_ref, valid_ref, out_ref):
    @pl.when(pl.program_id(1) == 0)
    def _():
        out_ref[...] = jnp.zeros_like(out_ref)

    loss = _bce_tile(pred_ref[...], tgt_ref[...])
    loss = loss * valid_ref[...].astype(jnp.float32)   # (tr, 1) lane-broadcast
    _accumulate(out_ref, loss)


# --------------------------------------------------------------------------- #
# Launch helpers
# --------------------------------------------------------------------------- #
def _round_up(x, m):
    return ((x + m - 1) // m) * m


def _choose_row_tile(rows, lane):
    """Rows per grid step: multiple of 8, ~2 MiB per f32 input tile, <= 2048."""
    target = max(_SUBLANE, _TILE_BYTES_TARGET // (lane * 4))
    tr = max(_SUBLANE, (min(2048, target) // _SUBLANE) * _SUBLANE)
    per_part = _round_up(max(1, -(-rows // _NUM_PARTITIONS)), _SUBLANE)
    return min(tr, per_part)


def _grid_geometry(rows, lane):
    tr = _choose_row_tile(rows, lane)
    per_part = max(1, -(-rows // _NUM_PARTITIONS))
    n_r = max(1, -(-per_part // tr))
    padded_rows = _NUM_PARTITIONS * n_r * tr
    return tr, n_r, padded_rows


def _pad_rows(x, padded_rows, pad_value):
    rows = x.shape[0]
    if rows == padded_rows:
        return x
    pad = [(0, padded_rows - rows)] + [(0, 0)] * (x.ndim - 1)
    return jnp.pad(x, pad, constant_values=pad_value)


def _compiler_params():
    return pltpu.CompilerParams(
        dimension_semantics=("parallel", "arbitrary"),
        vmem_limit_bytes=32 * 1024 * 1024,
    )


def _bce_sum_dense(pred_flat, tgt_flat):
    """Sum of elementwise BCE over a flat stream, lane-dense (rows, 128)."""
    n = pred_flat.shape[0]
    lane = _LANE
    rows = max(1, -(-n // lane))
    tr, n_r, padded_rows = _grid_geometry(rows, lane)
    padded_n = padded_rows * lane
    if padded_n != n:
        # BCE(pred=1, target=1) == 0, so padding does not change the sum.
        pred_flat = jnp.pad(pred_flat, (0, padded_n - n), constant_values=1.0)
        tgt_flat = jnp.pad(tgt_flat, (0, padded_n - n), constant_values=1.0)
    pred2 = pred_flat.reshape(padded_rows, lane)
    tgt2 = tgt_flat.reshape(padded_rows, lane)

    cost = pl.CostEstimate(
        flops=int(8 * padded_n),
        transcendentals=int(2 * padded_n),
        bytes_accessed=int(2 * padded_n * pred2.dtype.itemsize
                           + _NUM_PARTITIONS * _SUBLANE * lane * 4),
    )

    out = pl.pallas_call(
        _bce_dense_kernel,
        out_shape=jax.ShapeDtypeStruct((_NUM_PARTITIONS, _SUBLANE, lane),
                                       jnp.float32),
        grid_spec=pltpu.PrefetchScalarGridSpec(
            num_scalar_prefetch=0,
            grid=(_NUM_PARTITIONS, n_r),
            in_specs=[
                pl.BlockSpec((tr, lane), lambda p, r: (p * n_r + r, 0)),
                pl.BlockSpec((tr, lane), lambda p, r: (p * n_r + r, 0)),
            ],
            out_specs=pl.BlockSpec((1, _SUBLANE, lane), lambda p, r: (p, 0, 0)),
        ),
        compiler_params=_compiler_params(),
        cost_estimate=cost,
    )(pred2, tgt2)
    return jnp.sum(out)


def _bce_sum_masked(pred2, tgt2, valid2):
    """Sum of valid-masked elementwise BCE over (rows, K) with a (rows, 1) mask."""
    rows, lane = pred2.shape
    tr, n_r, padded_rows = _grid_geometry(rows, lane)
    pred2 = _pad_rows(pred2, padded_rows, 1.0)    # BCE(1, 1) == 0
    tgt2 = _pad_rows(tgt2, padded_rows, 1.0)
    valid2 = _pad_rows(valid2, padded_rows, 0.0)

    cost = pl.CostEstimate(
        flops=int(9 * padded_rows * lane),
        transcendentals=int(2 * padded_rows * lane),
        bytes_accessed=int(2 * padded_rows * lane * pred2.dtype.itemsize
                           + padded_rows * valid2.dtype.itemsize
                           + _NUM_PARTITIONS * _SUBLANE * lane * 4),
    )

    out = pl.pallas_call(
        _bce_masked_kernel,
        out_shape=jax.ShapeDtypeStruct((_NUM_PARTITIONS, _SUBLANE, lane),
                                       jnp.float32),
        grid_spec=pltpu.PrefetchScalarGridSpec(
            num_scalar_prefetch=0,
            grid=(_NUM_PARTITIONS, n_r),
            in_specs=[
                pl.BlockSpec((tr, lane), lambda p, r: (p * n_r + r, 0)),
                pl.BlockSpec((tr, lane), lambda p, r: (p * n_r + r, 0)),
                pl.BlockSpec((tr, 1), lambda p, r: (p * n_r + r, 0)),
            ],
            out_specs=pl.BlockSpec((1, _SUBLANE, lane), lambda p, r: (p, 0, 0)),
        ),
        compiler_params=_compiler_params(),
        cost_estimate=cost,
    )(pred2, tgt2, valid2)
    return jnp.sum(out)


# --------------------------------------------------------------------------- #
# Public wrapper
# --------------------------------------------------------------------------- #
@jax.jit
def cross_entropy_loss(pred, target, valid=None):
    """
    :param pred:   (B, N, K) array, probabilities in (0, 1).
    :param target: (B, N, K) array, values in [0, 1].
    :param valid:  (B, N) array or None.
    :return: () scalar, same dtype as pred (mean over ALL B*N*K elements,
             matching torch .mean() even when valid masks elements to zero).
    """
    B, N, K = pred.shape
    n_elems = B * N * K
    if valid is None:
        # Specialized lane-dense path: no valid stream at all.
        total = _bce_sum_dense(pred.reshape(-1), target.reshape(-1))
    else:
        total = _bce_sum_masked(
            pred.reshape(B * N, K),
            target.reshape(B * N, K),
            valid.astype(jnp.float32).reshape(B * N, 1),
        )
    return (total / float(n_elems)).astype(pred.dtype)


def _reference(pred, target, valid=None):
    p = pred.astype(jnp.float32)
    t = target.astype(jnp.float32)
    loss = -(t * jnp.maximum(jnp.log(p), -100.0)
             + (1.0 - t) * jnp.maximum(jnp.log(1.0 - p), -100.0))
    if valid is not None:
        loss = loss * valid.astype(jnp.float32)[:, :, None]
    return loss.mean()


if __name__ == "__main__":
    key = jax.random.PRNGKey(0)
    k1, k2, k3 = jax.random.split(key, 3)

    B, N, K = 2, 8, 32
    # pred must be a probability in (0, 1) for BCE.
    pred = jax.nn.sigmoid(jax.random.normal(k1, (B, N, K), dtype=jnp.float32))
    target = jax.random.uniform(k2, (B, N, K), dtype=jnp.float32)
    valid = (jax.random.uniform(k3, (B, N)) > 0.3).astype(jnp.float32)

    # Masked path.
    out = jax.block_until_ready(cross_entropy_loss(pred, target, valid))
    ref = jax.block_until_ready(_reference(pred, target, valid))
    np.testing.assert_allclose(np.asarray(out), np.asarray(ref), rtol=1e-5, atol=1e-6)

    # valid=None (lane-dense) path.
    out2 = jax.block_until_ready(cross_entropy_loss(pred, target, None))
    ref2 = jax.block_until_ready(_reference(pred, target, None))
    np.testing.assert_allclose(np.asarray(out2), np.asarray(ref2), rtol=1e-5, atol=1e-6)

    print("KERNEL_OK")
</pallas_src>

<mosaic_0001>
module attributes {stable_mosaic.version = 11 : i64} {
  func.func @_bce_masked_kernel(%arg0: i32, %arg1: i32, %arg2: memref<8x32xf32, #tpu.memory_space<vmem>>, %arg3: memref<8x32xf32, #tpu.memory_space<vmem>>, %arg4: memref<8x1xf32, #tpu.memory_space<vmem>>, %arg5: memref<1x8x32xf32, #tpu.memory_space<vmem>>) attributes {dimension_semantics = [#tpu.dimension_semantics<parallel>, #tpu.dimension_semantics<arbitrary>], iteration_bounds = array<i64: 2, 1>, scalar_prefetch = 0 : i64, scratch_operands = 0 : i64, tpu.core_type = #tpu.core_type<tc>, window_params = [{transform_indices = @transform_0, window_bounds = array<i64: 8, 32>}, {transform_indices = @transform_1, window_bounds = array<i64: 8, 32>}, {transform_indices = @transform_2, window_bounds = array<i64: 8, 1>}, {transform_indices = @transform_3, window_bounds = array<i64: 1, 8, 32>}]} {
    %c0_i32 = arith.constant 0 : i32
    %0 = arith.cmpi eq, %arg1, %c0_i32 : i32
    %1 = arith.extui %0 : i1 to i32
    %c0_i32_0 = arith.constant 0 : i32
    %2 = arith.cmpi ne, %1, %c0_i32_0 : i32
    scf.if %2 {
      %cst_17 = arith.constant 0.000000e+00 : f32
      %29 = vector.broadcast %cst_17 : f32 to vector<1x8x32xf32>
      %c0_18 = arith.constant 0 : index
      %c0_19 = arith.constant 0 : index
      %c0_20 = arith.constant 0 : index
      %30 = vector.load %arg5[%c0_18, %c0_19, %c0_20] : memref<1x8x32xf32, #tpu.memory_space<vmem>>, vector<1x8x32xf32>
      tpu.vector_store %arg5[%c0_18, %c0_19, %c0_20], %29 {strides = array<i32>} : memref<1x8x32xf32, #tpu.memory_space<vmem>>, vector<1x8x32xf32>,
    } else {
    }
    %c0 = arith.constant 0 : index
    %c0_1 = arith.constant 0 : index
    %3 = vector.load %arg2[%c0, %c0_1] : memref<8x32xf32, #tpu.memory_space<vmem>>, vector<8x32xf32>
    %c0_2 = arith.constant 0 : index
    %c0_3 = arith.constant 0 : index
    %4 = vector.load %arg3[%c0_2, %c0_3] : memref<8x32xf32, #tpu.memory_space<vmem>>, vector<8x32xf32>
    %5 = math.log %3 : vector<8x32xf32>
    %cst = arith.constant -1.000000e+02 : f32
    %6 = vector.broadcast %cst : f32 to vector<8x32xf32>
    %7 = arith.maximumf %5, %6 : vector<8x32xf32>
    %cst_4 = arith.constant 1.000000e+00 : f32
    %8 = vector.broadcast %cst_4 : f32 to vector<8x32xf32>
    %9 = arith.subf %8, %3 : vector<8x32xf32>
    %10 = math.log %9 : vector<8x32xf32>
    %cst_5 = arith.constant -1.000000e+02 : f32
    %11 = vector.broadcast %cst_5 : f32 to vector<8x32xf32>
    %12 = arith.maximumf %10, %11 : vector<8x32xf32>
    %13 = arith.mulf %4, %7 : vector<8x32xf32>
    %cst_6 = arith.constant 1.000000e+00 : f32
    %14 = vector.broadcast %cst_6 : f32 to vector<8x32xf32>
    %15 = arith.subf %14, %4 : vector<8x32xf32>
    %16 = arith.mulf %15, %12 : vector<8x32xf32>
    %17 = arith.addf %13, %16 : vector<8x32xf32>
    %cst_7 = arith.constant 0.000000e+00 : f32
    %18 = vector.broadcast %cst_7 : f32 to vector<8x32xf32>
    %19 = arith.subf %18, %17 : vector<8x32xf32>
    %c0_8 = arith.constant 0 : index
    %c0_9 = arith.constant 0 : index
    %20 = vector.load %arg4[%c0_8, %c0_9] : memref<8x1xf32, #tpu.memory_space<vmem>>, vector<8x1xf32>
    %21 = vector.broadcast %20 : vector<8x1xf32> to vector<8x32xf32>
    %22 = arith.mulf %19, %21 : vector<8x32xf32>
    %23 = vector.shape_cast %22 : vector<8x32xf32> to vector<1x8x32xf32>
    %cst_10 = arith.constant dense<0.000000e+00> : vector<8x32xf32>
    %24 = vector.multi_reduction <add>, %23, %cst_10 [0] : vector<1x8x32xf32> to vector<8x32xf32>
    %c0_11 = arith.constant 0 : index
    %c0_12 = arith.constant 0 : index
    %c0_13 = arith.constant 0 : index
    %25 = vector.load %arg5[%c0_11, %c0_12, %c0_13] : memref<1x8x32xf32, #tpu.memory_space<vmem>>, vector<1x8x32xf32>
    %26 = vector.shape_cast %24 : vector<8x32xf32> to vector<1x8x32xf32>
    %27 = arith.addf %25, %26 : vector<1x8x32xf32>
    %c0_14 = arith.constant 0 : index
    %c0_15 = arith.constant 0 : index
    %c0_16 = arith.constant 0 : index
    %28 = vector.load %arg5[%c0_14, %c0_15, %c0_16] : memref<1x8x32xf32, #tpu.memory_space<vmem>>, vector<1x8x32xf32>
    tpu.vector_store %arg5[%c0_14, %c0_15, %c0_16], %27 {strides = array<i32>} : memref<1x8x32xf32, #tpu.memory_space<vmem>>, vector<1x8x32xf32>,
    return
  }
  func.func @transform_0(%arg0: i32, %arg1: i32) -> (i32, i32) {
    %c1_i32 = arith.constant 1 : i32
    %0 = arith.muli %arg0, %c1_i32 : i32
    %1 = arith.addi %0, %arg1 : i32
    %c0_i32 = arith.constant 0 : i32
    %c0_i32_0 = arith.constant 0 : i32
    return %1, %c0_i32 : i32, i32
  }
  func.func @transform_1(%arg0: i32, %arg1: i32) -> (i32, i32) {
    %c1_i32 = arith.constant 1 : i32
    %0 = arith.muli %arg0, %c1_i32 : i32
    %1 = arith.addi %0, %arg1 : i32
    %c0_i32 = arith.constant 0 : i32
    %c0_i32_0 = arith.constant 0 : i32
    return %1, %c0_i32 : i32, i32
  }
  func.func @transform_2(%arg0: i32, %arg1: i32) -> (i32, i32) {
    %c1_i32 = arith.constant 1 : i32
    %0 = arith.muli %arg0, %c1_i32 : i32
    %1 = arith.addi %0, %arg1 : i32
    %c0_i32 = arith.constant 0 : i32
    %c0_i32_0 = arith.constant 0 : i32
    return %1, %c0_i32 : i32, i32
  }
  func.func @transform_3(%arg0: i32, %arg1: i32) -> (i32, i32, i32) {
    %c0_i32 = arith.constant 0 : i32
    %c0_i32_0 = arith.constant 0 : i32
    %c0_i32_1 = arith.constant 0 : i32
    return %arg0, %c0_i32, %c0_i32_0 : i32, i32, i32
  }
}

</mosaic_0001>

<bundles_post_ra>
// kernel: cross_entropy_loss.1
= control target key start
LH: loop header
LB: loop body
LE: loop exit
PB: predicated region body
PF: predicated region fallthrough
CT: control target
= control target key end

     0   :  { %8 = vsyncpa [#allocation3], 0  ;;  %s693_s0 = inlined_call_operand.vmem [shape: f32[16,32], index: 0, kind: input, shape index: {}]   ;;  %s694_s1 = inlined_call_operand.hbm [shape: f32[16,32], index: 1, kind: input, shape index: {}]   ;;  %s695_s2 = inlined_call_operand.vmem [shape: f32[16,1], index: 2, kind: input, shape index: {}]   ;;  %s696_s3 = inlined_call_operand.vmem [shape: f32[2,8,32], index: 3, kind: output, shape index: {}]  }
   0x1   :  { %10 = vsyncpa [#allocation3 + $0x1], 0  ;;  %s560_s12 = smov 0   ;;  %s562_s13 = smov 0  }
   0x2   :  { %s564_s14 = smov 0   ;;  %s566_s15 = smov 0  }
   0x3   :  { %s568_s16 = smov 0   ;;  %s570_s17 = smov 0  }
   0x4 LB: > { %s380_s18 = sadd.s32 4294967295, %s535_s17   ;;  %s28_s19 = sadd.s32 1, %s531_s16  ;;  %s535_s17 = sphi %s570_s17, %s16_s17   ;;  %s531_s16 = sphi %s568_s16, %s706_s16   ;;  %s527_s15 = sphi %s566_s15, %s705_s15   ;;  %s523_s14 = sphi %s564_s14, %s704_s14   ;;  %s519_s13 = sphi %s562_s13, %s703_s13   ;;  %s515_s12 = sphi %s560_s12, %s702_s12  }
   0x5   : > { %p30_p0 = scmp.ge.s32.totalorder %s28_s19, 2  ;;  %s65_s20 = sadd.s32 1, %s523_s14 }
   0x6   : > { %p72_p1 = scmp.ne.s32.totalorder %s523_s14, %s519_s13  ;;  %p73_p2 = scmp.eq.s32.totalorder %s535_s17, 0 }
   0x7   : > { %s708_s19 = smov (%p30_p0, %s28_s19), 0  ;;  %p78_p4 = scmp.ne.s32.totalorder %s519_s13, %s515_s12 }
   0x8   : > { %p596_p3 = por %p73_p2, %p72_p1  ;;  %s62_s22 = ssub.s32 %s531_s16, %s708_s19 }
   0x9   : > { %p79_p5 = scmp.eq.s32.totalorder %s380_s18, 0  ;;  %p63_p6 = scmp.eq.s32.totalorder %s62_s22, 0 }
   0xa   : > { %p399_p8 = scmp.lt.s32.totalorder %s535_s17, 2  ;;  %s165_s25 = sand.u32 1, %s523_s14  }
   0xb   : > { %p603_p7 = por %p79_p5, %p78_p4  ;;  %s385_s26 = sshll.u32 %s531_s16, 7 }
   0xc   : > { %s609_s24 = scalar_select %p63_p6, %s523_s14, %s65_s20  }
   0xd   : > { %s384_s27 = sshll.u32 %s165_s25, 3  ;;  %s616_s30 = scalar_lea.hbm %s694_s1, %s385_s26 }
   0xe   : > { %s169_s4 = scalar_lea.vmem [#allocation2], %s384_s27  ;;  %p620_p9 = pnand %p399_p8, %p596_p3 }
   0xf   : > { %s177_s5 = sshll.u32 %s169_s4, 4  ;;  %s166_s7 = scalar_lea.sflag [#allocation3], %s165_s25  ;;  %s624_s5 = int_to_ptr.vmem [resolvable:$true] %s177_s5 }
  0x10   : > { %s455_s8 = scalar_lea.hbm %s616_s30, 128  ;;  %p457_p13 = pneg %p620_p9 }
  0x11   : > { %p456_p12 = scmp.ne.s32.totalorder %s616_s30, %s455_s8  ;;  %s460_s11 = scalar_lea.hbm %s694_s1, 256 }
  0x12   : > { %p461_p2 = scmp.lt.u32.totalorder %s616_s30, %s694_s1  ;;  %p462_p3 = scmp.lt.u32.totalorder %s460_s11, %s455_s8 }
  0x13   : > { %p458_p0 = pnand %p457_p13, %p456_p12  ;;  %p464_p5 = scmp.lt.u32.totalorder %s455_s8, %s616_s30 }
  0x14   : > { %p463_p4 = por %p462_p3, %p461_p2 }
  0x15   : > { %p459_p1 = pneg %p458_p0 }
  0x16   : > { %p465_p6 = por %p464_p5, %p463_p4 }
  0x18   : > { %p466_p8 = pnand %p465_p6, %p459_p1 }
  0x1a   : > { %469 = shalt.err (!%p466_p8)
}
  0x1b   : > { %s470_s20 = scalar_lea.vmem %s624_s5, 128  ;;  %s537_s21 = smov [#allocation2]  }
  0x1c   : > { %p471_p12 = scmp.ne.s32.totalorder %s624_s5, %s470_s20  ;;  %s475_s22 = sshll.u32 %s537_s21, 4  ;;  %s476_s22 = int_to_ptr.vmem [resolvable:$false] %s475_s22 }
  0x1d   : > { %s477_s25 = scalar_lea.vmem %s476_s22, 256  ;;  %p478_p11 = scmp.lt.s32.totalorder %s624_s5, %s476_s22 }
  0x1e   : > { %p473_p0 = pnand %p471_p12, %p457_p13  ;;  %p479_p2 = scmp.lt.s32.totalorder %s477_s25, %s470_s20 }
  0x20   : > { %p474_p10 = pneg %p473_p0  ;;  %p480_p3 = por %p479_p2, %p478_p11 }
  0x22   : > { %p481_p4 = pnand %p480_p3, %p474_p10 }
  0x24   : > { %484 = shalt.err (!%p481_p4)
}
  0x25   : > { %398 = dma.hbm_to_vmem [thread:$0]  (!%p620_p9), %s616_s30, 128, %s624_s5, %s166_s7  }
  0x26   : > { %p700_p1 = scmp.lt.s32.totalorder %s535_s17, 3  ;;  %p701_p5 = scmp.ge.s32.totalorder %s535_s17, 1 }
  0x28   : > { %p192_p13 = pnand %p701_p5, %p700_p1 }
  0x29   : > { %s197_s26 = sand.u32 (!%p192_p13), 1, %s519_s13  }
  0x2a   : > { %195 = sbr.rel (%p192_p13) target bundleno = 189 (0xbd), region = 32  ;;  %s387_s27 = sshll.u32 (!%p192_p13), %s197_s26, 3 }
  0x2b   : > { %s198_s28 = scalar_lea.sflag (!%p192_p13), [#allocation3], %s197_s26  ;;  %s201_s29 = scalar_lea.vmem (!%p192_p13), [#allocation2], %s387_s27 }
  0x31   : > { %510 = dma.done.wait (%p603_p7), %s198_s28, 128  }
  0x32   : > { %512 = vsyncadd (%p603_p7), %s198_s28, 4294967168  ;;  %p234_p10 = scmp.lt.s32.totalorder %s527_s15, 1  ;;  %v538_v0 = vmov 0   ;;  %vm254_vm0 = vcmask 261120   ;;  %v539_v2 = vmov 0.0   ;;  %v257_v9 = vld [vmem:[%s201_s29] sm:$0xff] }
  0x33   : > { %450 = vset.pattern.permute.xlu0 %v538_v0  ;;  %v266_v12 = vsub.f32 1.0, %v257_v9 }
  0x34   : > { %s710_s15 = smov (!%p234_p10, %s527_s15), 1 }
  0x35   : > { %s388_s30 = sshll.u32 %s710_s15, 3 }
  0x36   : > { %s244_s6 = scalar_lea.vmem %s695_s2, %s388_s30  ;;  %s249_s9 = scalar_lea.vmem %s696_s3, %s388_s30 }
  0x37   : > { %v270_v1 = vld [vmem:[%s244_s6] sm:$0xff]  ;;  %255 = vst.msk [vmem:[%s249_s9] sm:$0xff] %vm254_vm0, %v539_v2  ;;  %s237_s11 = scalar_lea.vmem %s693_s0, %s388_s30 }
  0x38   : > { %273 = vperm.xlu0 %450, %v270_v1   ;;  %v256_v3 = vld [vmem:[%s237_s11] sm:$0xff] }
  0x39   : > { %v261_v4 = vsub.f32 1.0, %v256_v3  ;;  %451 = vlog2.f32 %v256_v3 }
  0x3b   : > { %453 = vlog2.f32 %v261_v4 }
  0x3e   : > { %v278_v18 = vld [vmem:[%s249_s9] sm:$0xff] }
  0x43   : > { %v452_v5 = vpop.eup %451 }
  0x44   : > { %v259_v7 = vmul.f32 0.6931472, %v452_v5 }
  0x45   : > { %v454_v6 = vpop.eup %453 }
  0x46   : > { %v263_v8 = vmul.f32 0.6931472, %v454_v6  ;;  %v260_v10 = vmax.f32 %v259_v7, -100.0 }
  0x48   : > { %v264_v11 = vmax.f32 %v263_v8, -100.0  ;;  %v265_v13 = vmul.f32 %v260_v10, %v257_v9 }
  0x4a   : > { %v267_v14 = vmul.f32 %v266_v12, %v264_v11 }
  0x4c   : > { %v268_v15 = vadd.f32 %v267_v14, %v265_v13 }
  0x4e   : > { %v269_v16 = vsub.f32 0.0, %v268_v15 }
  0xb7   : > { %v274_v17 = vpop.permute.xlu0 %273 }
  0xb8   : > { %v276_v19 = vmul.f32 %v274_v17, %v269_v16 }
  0xba   : > { %v279_v20 = vadd.f32 %v278_v18, %v276_v19 }
  0xbc   : > { %281 = vst.msk [vmem:[%s249_s9] sm:$0xff] %vm254_vm0, %v279_v20 }
  0xbd PF: > { %s16_s17 = sadd.s32 1, %s535_s17   ;;  %s702_s12 = smov %s519_s13 }
  0xbe   : > { %p13_p7 = scmp.ge.s32.totalorder %s16_s17, 4   ;;  %s703_s13 = smov %s523_s14 }
  0xbf   : > { %s704_s14 = smov %s609_s24  ;;  %s705_s15 = smov %s531_s16 }
  0xc0   : > { %s706_s16 = smov %s708_s19  ;;  %15 = sbr.rel (!%p13_p7) target bundleno = 4 (0x4), region = 82 }
  0xc7   :  { %301 = vsyncpa [#allocation3], 1 }
  0xc8   :  { %303 = vsyncpa [#allocation3 + $0x1], 1 }

</bundles_post_ra>
